<compile_context>
chip_gen: v6e
topology: v6e:2x2x1
jax: 0.10.0
libtpu: 0.0.40
codegen_flags: <defaults>
</compile_context>

<pallas_src>
import functools

import jax
import jax.numpy as jnp
from jax.experimental import pallas as pl
from jax.experimental.pallas import tpu as pltpu

LANE = 128


def _round_up(n, m):
    return ((n + m - 1) // m) * m


def _pick_tile(dim, pref=512):
    """Largest tile in {pref, 512, 256, 128} dividing dim (dims are padded x128)."""
    for cand in (pref, 512, 256, 128):
        if cand <= pref and dim % cand == 0:
            return cand
    return LANE


# ---------------------------------------------------------------------------
# Pallas kernels
# ---------------------------------------------------------------------------
def _fused_encode_kernel(a_ref, dinv_ref, x_ref,
                         w1_ref, b1_ref, w2_ref, b2_ref, w3_ref, b3_ref,
                         z_ref):
    """All three GCNConv layers in VMEM: relu(c1) -> relu(c2) -> c3."""
    a = a_ref[...]                       # [N, N] bf16
    dinv = dinv_ref[...]                 # [N, 1] f32

    def conv(h, w_ref, b_ref, relu):
        xw = jnp.dot(h.astype(jnp.bfloat16), w_ref[...].astype(jnp.bfloat16),
                     preferred_element_type=jnp.float32)
        xw = (dinv * xw).astype(jnp.bfloat16)          # D^{-1/2} (X W)
        agg = jnp.dot(a, xw, preferred_element_type=jnp.float32)
        out = dinv * agg + b_ref[...]                  # D^{-1/2} A_hat (.) + b
        if relu:
            out = jnp.maximum(out, 0.0)
        return out

    h1 = conv(x_ref[...], w1_ref, b1_ref, True)
    h2 = conv(h1, w2_ref, b2_ref, True)
    z = conv(h2, w3_ref, b3_ref, False)
    z_ref[...] = z.astype(z_ref.dtype)


def _linear_scale_kernel(x_ref, w_ref, dinv_ref, o_ref):
    """One node-row block of  D^{-1/2} (X @ W);  bf16 MXU, f32 accumulate."""
    xb = x_ref[...].astype(jnp.bfloat16)
    wb = w_ref[...].astype(jnp.bfloat16)
    xw = jnp.dot(xb, wb, preferred_element_type=jnp.float32)
    o_ref[...] = (dinv_ref[...] * xw).astype(o_ref.dtype)


def _aggregate_kernel(a_ref, xw_ref, dinv_ref, b_ref, o_ref, acc_ref, *, relu):
    """out = act( D^{-1/2} (A_hat @ xw_scaled) + b ),  K-tiled f32 accumulator."""
    @pl.when(pl.program_id(2) == 0)
    def _():
        acc_ref[...] = jnp.zeros_like(acc_ref)

    acc_ref[...] += jnp.dot(a_ref[...], xw_ref[...],
                            preferred_element_type=jnp.float32)

    @pl.when(pl.program_id(2) == pl.num_programs(2) - 1)
    def _():
        out = dinv_ref[...] * acc_ref[...] + b_ref[...]
        if relu:
            out = jnp.maximum(out, 0.0)
        o_ref[...] = out.astype(o_ref.dtype)


def _decode_kernel(zs_ref, zd_ref, p_ref):
    """Edge block decode; feature axis on sublanes -> lane-dense (1, TE) output."""
    prod = zs_ref[...] * zd_ref[...]                  # [H_pad, TE] f32
    logits = jnp.sum(prod, axis=0, keepdims=True)     # [1, TE]
    p_ref[...] = jax.nn.sigmoid(logits)


# ---------------------------------------------------------------------------
# Wrappers
# ---------------------------------------------------------------------------
def _full_spec(shape):
    return pl.BlockSpec(shape, lambda i, _s=shape: tuple(0 for _ in _s))


def _fused_encode(a_hat, dinv, x, params_pad, vmem_limit):
    """Single-launch encode when the whole (padded) problem fits in VMEM."""
    (w1, b1), (w2, b2), (w3, b3) = params_pad
    n_pad = a_hat.shape[0]
    h_pad = w1.shape[1]
    args = (a_hat, dinv, x, w1, b1, w2, b2, w3, b3)
    return pl.pallas_call(
        _fused_encode_kernel,
        out_shape=jax.ShapeDtypeStruct((n_pad, h_pad), jnp.float32),
        grid=(1,),
        in_specs=[_full_spec(a.shape) for a in args],
        out_specs=_full_spec((n_pad, h_pad)),
        compiler_params=pltpu.CompilerParams(
            dimension_semantics=("arbitrary",),
            vmem_limit_bytes=vmem_limit),
    )(*args)


def _gcn_conv(a_hat, dinv, x, w, b, *, relu, out_dtype, vmem_limit):
    """One GCNConv layer: two tiled pallas_calls (linear+scale, then aggregate)."""
    n_pad = a_hat.shape[0]
    f_in = x.shape[1]
    f_out = w.shape[1]

    # --- D^{-1/2} (X @ W), tiled over node rows --------------------------------
    tm_l = _pick_tile(n_pad, 256)
    xw = pl.pallas_call(
        _linear_scale_kernel,
        out_shape=jax.ShapeDtypeStruct((n_pad, f_out), jnp.bfloat16),
        grid=(n_pad // tm_l,),
        in_specs=[
            pl.BlockSpec((tm_l, f_in), lambda i: (i, 0)),
            pl.BlockSpec((f_in, f_out), lambda i: (0, 0)),
            pl.BlockSpec((tm_l, 1), lambda i: (i, 0)),
        ],
        out_specs=pl.BlockSpec((tm_l, f_out), lambda i: (i, 0)),
        compiler_params=pltpu.CompilerParams(
            dimension_semantics=("parallel",),
            vmem_limit_bytes=vmem_limit),
    )(x, w, dinv)

    # --- D^{-1/2} (A_hat @ xw) + b, tiled (rows, cols, reduction) --------------
    tm = _pick_tile(n_pad, 256)
    tn = _pick_tile(f_out, 256)
    tk = _pick_tile(n_pad, 512)
    grid = (n_pad // tm, f_out // tn, n_pad // tk)

    out = pl.pallas_call(
        functools.partial(_aggregate_kernel, relu=relu),
        out_shape=jax.ShapeDtypeStruct((n_pad, f_out), out_dtype),
        grid=grid,
        in_specs=[
            pl.BlockSpec((tm, tk), lambda i, j, k: (i, k)),   # A_hat tile (bf16)
            pl.BlockSpec((tk, tn), lambda i, j, k: (k, j)),   # xw tile (bf16)
            pl.BlockSpec((tm, 1), lambda i, j, k: (i, 0)),    # row D^{-1/2}
            pl.BlockSpec((1, tn), lambda i, j, k: (0, j)),    # bias
        ],
        out_specs=pl.BlockSpec((tm, tn), lambda i, j, k: (i, j)),
        scratch_shapes=[pltpu.VMEM((tm, tn), jnp.float32)],
        compiler_params=pltpu.CompilerParams(
            dimension_semantics=("parallel", "parallel", "arbitrary"),
            vmem_limit_bytes=vmem_limit),
    )(a_hat, xw, dinv, b)
    return out


def gcn_decode(z_pad, edge_index, num_edges, vmem_limit):
    """sigmoid(sum(z[src] * z[dst], -1)) with a lane-dense, edge-tiled kernel."""
    e = num_edges
    e_pad = _round_up(max(e, 1), LANE)
    h_pad = z_pad.shape[1]
    ei = jnp.pad(edge_index, ((0, 0), (0, e_pad - e)))

    # TODO(synk): fuse the endpoint gather into the kernel (scalar-prefetch row
    # gather / manual DMA from z in pl.ANY) instead of materializing zs/zd in XLA.
    zs_t = z_pad[ei[0]].T      # [H_pad, E_pad], features on sublanes
    zd_t = z_pad[ei[1]].T

    te = _pick_tile(e_pad, 512)
    probs = pl.pallas_call(
        _decode_kernel,
        out_shape=jax.ShapeDtypeStruct((1, e_pad), jnp.float32),
        grid=(e_pad // te,),
        in_specs=[
            pl.BlockSpec((h_pad, te), lambda i: (0, i)),
            pl.BlockSpec((h_pad, te), lambda i: (0, i)),
        ],
        out_specs=pl.BlockSpec((1, te), lambda i: (0, i)),
        compiler_params=pltpu.CompilerParams(
            dimension_semantics=("parallel",),
            vmem_limit_bytes=vmem_limit),
    )(zs_t, zd_t)
    return probs[0, :e]


def gcn_forward(x, edge_index, params, num_nodes):
    """Mirrors GCN.forward for a `data` object that has train_pos_edge_index."""
    (w1, b1), (w2, b2), (w3, b3) = params
    n = num_nodes
    f_in = x.shape[1]
    hid = w1.shape[1]

    # ---- glue: dense A_hat in message-passing direction + remaining self loops
    # TODO(synk): for large sparse graphs, replace the dense NxN adjacency with a
    # CSR gather/accumulate aggregation (scalar-prefetch row pointers).
    src, dst = edge_index[0], edge_index[1]
    a = jnp.zeros((n, n), jnp.float32).at[dst, src].add(1.0)   # out[dst] += x[src]
    diag = jnp.diagonal(a)
    a = a + jnp.diag(jnp.where(diag > 0.0, 0.0, 1.0))          # add_remaining_self_loops
    deg = jnp.sum(a, axis=1)                                   # in-degree (+ self loop)
    dinv = jnp.where(deg > 0.0, jax.lax.rsqrt(deg), 0.0)

    # ---- pad to lane-aligned shapes (multiples of 128 on every matmul axis) ----
    n_pad = _round_up(n, LANE)
    fi_pad = _round_up(f_in, LANE)
    h_pad = _round_up(hid, LANE)

    a_pad = jnp.pad(a, ((0, n_pad - n), (0, n_pad - n))).astype(jnp.bfloat16)
    dinv_pad = jnp.pad(dinv, (0, n_pad - n)).reshape(n_pad, 1)
    x_pad = jnp.pad(x, ((0, n_pad - n), (0, fi_pad - f_in)))

    def pad_wb(w, b, fin_p):
        wp = jnp.pad(w, ((0, fin_p - w.shape[0]), (0, h_pad - w.shape[1])))
        bp = jnp.pad(b, ((0, 0), (0, h_pad - b.shape[1])))
        return wp, bp

    w1p, b1p = pad_wb(w1, b1, fi_pad)
    w2p, b2p = pad_wb(w2, b2, h_pad)
    w3p, b3p = pad_wb(w3, b3, h_pad)
    params_pad = ((w1p, b1p), (w2p, b2p), (w3p, b3p))

    # Raised above the default scoped limit, kept below v7x's 64 MiB physical VMEM.
    vmem_limit = 48 * 1024 * 1024

    # VMEM footprint estimate of the fused single-launch encode (inputs are
    # double-buffered by the pipeline; add headroom for f32 intermediates).
    fused_in_bytes = (
        n_pad * n_pad * 2 + n_pad * fi_pad * 4 + n_pad * 4
        + (fi_pad * h_pad + 2 * h_pad * h_pad + 3 * h_pad) * 4
        + n_pad * h_pad * 4)
    fused_fits = (2 * fused_in_bytes + 6 * n_pad * h_pad * 4) <= 20 * 1024 * 1024

    if fused_fits:
        # encode fully fused in one kernel: no HBM round trips between layers.
        z = _fused_encode(a_pad, dinv_pad, x_pad, params_pad, vmem_limit)
    else:
        # tiled per-layer path for large graphs (bf16 inter-layer activations).
        h1 = _gcn_conv(a_pad, dinv_pad, x_pad, w1p, b1p, relu=True,
                       out_dtype=jnp.bfloat16, vmem_limit=vmem_limit)
        h2 = _gcn_conv(a_pad, dinv_pad, h1, w2p, b2p, relu=True,
                       out_dtype=jnp.bfloat16, vmem_limit=vmem_limit)
        z = _gcn_conv(a_pad, dinv_pad, h2, w3p, b3p, relu=False,
                      out_dtype=jnp.float32, vmem_limit=vmem_limit)

    # decode(z, edge_index)
    return gcn_decode(z, edge_index, edge_index.shape[1], vmem_limit)


# ---------------------------------------------------------------------------
# Deterministic parameter init (shapes from GCN.__init__)
# ---------------------------------------------------------------------------
def init_params(key, input_dim, hidden_dim):
    dims = [(input_dim, hidden_dim), (hidden_dim, hidden_dim), (hidden_dim, hidden_dim)]
    params = []
    for i, (fin, fout) in enumerate(dims):
        k = jax.random.fold_in(key, i)
        bound = (6.0 / (fin + fout)) ** 0.5               # glorot uniform
        w = jax.random.uniform(k, (fin, fout), jnp.float32, -bound, bound)
        b = jnp.zeros((1, fout), jnp.float32)
        params.append((w, b))
    return params


if __name__ == "__main__":
    key = jax.random.PRNGKey(0)

    N = 16          # nodes
    INPUT_DIM = 8   # input feature dim
    HIDDEN = 32     # hidden dim

    # node features
    x = jax.random.normal(jax.random.fold_in(key, 100), (N, INPUT_DIM), jnp.float32)

    # deterministic ring graph, both directions -> edge_index shape [2, E], E = 2N
    idx = jnp.arange(N, dtype=jnp.int32)
    src = jnp.concatenate([idx, (idx + 1) % N])
    dst = jnp.concatenate([(idx + 1) % N, idx])
    edge_index = jnp.stack([src, dst], axis=0)            # [2, 32]

    params = init_params(jax.random.fold_in(key, 7), INPUT_DIM, HIDDEN)

    fwd = jax.jit(gcn_forward, static_argnums=(3,))
    out = fwd(x, edge_index, params, N)                   # [E] edge probabilities
    jax.block_until_ready(out)

    assert out.shape == (edge_index.shape[1],)
    assert bool(jnp.all(jnp.isfinite(out)))
    print("KERNEL_OK")
</pallas_src>

<mosaic_0001>
module attributes {stable_mosaic.version = 11 : i64} {
  func.func private @main(%arg0: i32) attributes {dimension_semantics = [#tpu.dimension_semantics<core_parallel>], iteration_bounds = array<i64: 2>, tpu.core_type = #tpu.core_type<sc_scalar_subcore>, window_params = []} {
    return
  }
}

module attributes {stable_mosaic.version = 11 : i64} {
  func.func private @main(%arg0: i32) attributes {dimension_semantics = [#tpu.dimension_semantics<core_parallel>], iteration_bounds = array<i64: 2>, tpu.core_type = #tpu.core_type<sc_scalar_subcore>, window_params = []} {
    return
  }
}

module attributes {stable_mosaic.version = 11 : i64} {
  func.func @_decode_kernel(%arg0: i32, %arg1: memref<128x128xf32, #tpu.memory_space<vmem>>, %arg2: memref<128x128xf32, #tpu.memory_space<vmem>>, %arg3: memref<1x128xf32, #tpu.memory_space<vmem>>) attributes {dimension_semantics = [#tpu.dimension_semantics<parallel>], iteration_bounds = array<i64: 1>, scalar_prefetch = 0 : i64, scratch_operands = 0 : i64, tpu.core_type = #tpu.core_type<tc>, window_params = [{transform_indices = @transform_0, window_bounds = array<i64: 128, 128>}, {transform_indices = @transform_1, window_bounds = array<i64: 128, 128>}, {transform_indices = @transform_2, window_bounds = array<i64: 1, 128>}]} {
    %c0 = arith.constant 0 : index
    %c0_0 = arith.constant 0 : index
    %0 = vector.load %arg1[%c0, %c0_0] : memref<128x128xf32, #tpu.memory_space<vmem>>, vector<128x128xf32>
    %c0_1 = arith.constant 0 : index
    %c0_2 = arith.constant 0 : index
    %1 = vector.load %arg2[%c0_1, %c0_2] : memref<128x128xf32, #tpu.memory_space<vmem>>, vector<128x128xf32>
    %2 = arith.mulf %0, %1 : vector<128x128xf32>
    %cst = arith.constant dense<0.000000e+00> : vector<128xf32>
    %3 = vector.multi_reduction <add>, %2, %cst [0] : vector<128x128xf32> to vector<128xf32>
    %4 = vector.shape_cast %3 : vector<128xf32> to vector<1x128xf32>
    %5 = arith.negf %4 : vector<1x128xf32>
    %6 = math.exp %5 : vector<1x128xf32>
    %cst_3 = arith.constant 1.000000e+00 : f32
    %7 = vector.broadcast %cst_3 : f32 to vector<1x128xf32>
    %8 = arith.addf %7, %6 : vector<1x128xf32>
    %9 = arith.divf %7, %8 : vector<1x128xf32>
    %c0_4 = arith.constant 0 : index
    %c0_5 = arith.constant 0 : index
    %10 = vector.load %arg3[%c0_4, %c0_5] : memref<1x128xf32, #tpu.memory_space<vmem>>, vector<1x128xf32>
    tpu.vector_store %arg3[%c0_4, %c0_5], %9 {strides = array<i32>} : memref<1x128xf32, #tpu.memory_space<vmem>>, vector<1x128xf32>,
    return
  }
  func.func @transform_0(%arg0: i32) -> (i32, i32) {
    %c0_i32 = arith.constant 0 : i32
    %c0_i32_0 = arith.constant 0 : i32
    return %c0_i32, %arg0 : i32, i32
  }
  func.func @transform_1(%arg0: i32) -> (i32, i32) {
    %c0_i32 = arith.constant 0 : i32
    %c0_i32_0 = arith.constant 0 : i32
    return %c0_i32, %arg0 : i32, i32
  }
  func.func @transform_2(%arg0: i32) -> (i32, i32) {
    %c0_i32 = arith.constant 0 : i32
    %c0_i32_0 = arith.constant 0 : i32
    return %c0_i32, %arg0 : i32, i32
  }
}

module attributes {stable_mosaic.version = 11 : i64} {
  func.func @_fused_encode_kernel(%arg0: i32, %arg1: memref<128x128xbf16, #tpu.memory_space<vmem>>, %arg2: memref<128x1xf32, #tpu.memory_space<vmem>>, %arg3: memref<128x128xf32, #tpu.memory_space<vmem>>, %arg4: memref<128x128xf32, #tpu.memory_space<vmem>>, %arg5: memref<1x128xf32, #tpu.memory_space<vmem>>, %arg6: memref<128x128xf32, #tpu.memory_space<vmem>>, %arg7: memref<1x128xf32, #tpu.memory_space<vmem>>, %arg8: memref<128x128xf32, #tpu.memory_space<vmem>>, %arg9: memref<1x128xf32, #tpu.memory_space<vmem>>, %arg10: memref<128x128xf32, #tpu.memory_space<vmem>>) attributes {dimension_semantics = [#tpu.dimension_semantics<arbitrary>], iteration_bounds = array<i64: 1>, scalar_prefetch = 0 : i64, scratch_operands = 0 : i64, tpu.core_type = #tpu.core_type<tc>, window_params = [{pipeline_mode = #tpu.pipeline_mode<synchronous>, transform_indices = @transform_0, window_bounds = array<i64: 128, 128>}, {pipeline_mode = #tpu.pipeline_mode<synchronous>, transform_indices = @transform_1, window_bounds = array<i64: 128, 1>}, {pipeline_mode = #tpu.pipeline_mode<synchronous>, transform_indices = @transform_2, window_bounds = array<i64: 128, 128>}, {pipeline_mode = #tpu.pipeline_mode<synchronous>, transform_indices = @transform_3, window_bounds = array<i64: 128, 128>}, {pipeline_mode = #tpu.pipeline_mode<synchronous>, transform_indices = @transform_4, window_bounds = array<i64: 1, 128>}, {pipeline_mode = #tpu.pipeline_mode<synchronous>, transform_indices = @transform_5, window_bounds = array<i64: 128, 128>}, {pipeline_mode = #tpu.pipeline_mode<synchronous>, transform_indices = @transform_6, window_bounds = array<i64: 1, 128>}, {pipeline_mode = #tpu.pipeline_mode<synchronous>, transform_indices = @transform_7, window_bounds = array<i64: 128, 128>}, {pipeline_mode = #tpu.pipeline_mode<synchronous>, transform_indices = @transform_8, window_bounds = array<i64: 1, 128>}, {pipeline_mode = #tpu.pipeline_mode<synchronous>, transform_indices = @transform_9, window_bounds = array<i64: 128, 128>}]} {
    %c0 = arith.constant 0 : index
    %c0_0 = arith.constant 0 : index
    %0 = vector.load %arg1[%c0, %c0_0] : memref<128x128xbf16, #tpu.memory_space<vmem>>, vector<128x128xbf16>
    %c0_1 = arith.constant 0 : index
    %c0_2 = arith.constant 0 : index
    %1 = vector.load %arg2[%c0_1, %c0_2] : memref<128x1xf32, #tpu.memory_space<vmem>>, vector<128x1xf32>
    %c0_3 = arith.constant 0 : index
    %c0_4 = arith.constant 0 : index
    %2 = vector.load %arg3[%c0_3, %c0_4] : memref<128x128xf32, #tpu.memory_space<vmem>>, vector<128x128xf32>
    %3 = arith.truncf %2 : vector<128x128xf32> to vector<128x128xbf16>
    %c0_5 = arith.constant 0 : index
    %c0_6 = arith.constant 0 : index
    %4 = vector.load %arg4[%c0_5, %c0_6] : memref<128x128xf32, #tpu.memory_space<vmem>>, vector<128x128xf32>
    %5 = arith.truncf %4 : vector<128x128xf32> to vector<128x128xbf16>
    %cst = arith.constant dense<0.000000e+00> : vector<128x128xf32>
    %6 = tpu.matmul %3, %5, %cst {dimension_numbers = #tpu.dot_dimension_numbers<[1], [0], [0], [1], [0, 0, 1, 1], [], []>} : vector<128x128xbf16>, vector<128x128xbf16>, vector<128x128xf32> -> vector<128x128xf32>
    %7 = vector.broadcast %1 : vector<128x1xf32> to vector<128x128xf32>
    %8 = arith.mulf %7, %6 : vector<128x128xf32>
    %9 = arith.truncf %8 : vector<128x128xf32> to vector<128x128xbf16>
    %cst_7 = arith.constant dense<0.000000e+00> : vector<128x128xf32>
    %10 = tpu.matmul %0, %9, %cst_7 {dimension_numbers = #tpu.dot_dimension_numbers<[1], [0], [0], [1], [0, 0, 1, 1], [], []>} : vector<128x128xbf16>, vector<128x128xbf16>, vector<128x128xf32> -> vector<128x128xf32>
    %11 = vector.broadcast %1 : vector<128x1xf32> to vector<128x128xf32>
    %12 = arith.mulf %11, %10 : vector<128x128xf32>
    %c0_8 = arith.constant 0 : index
    %c0_9 = arith.constant 0 : index
    %13 = vector.load %arg5[%c0_8, %c0_9] : memref<1x128xf32, #tpu.memory_space<vmem>>, vector<1x128xf32>
    %14 = vector.broadcast %13 : vector<1x128xf32> to vector<128x128xf32>
    %15 = arith.addf %12, %14 : vector<128x128xf32>
    %cst_10 = arith.constant 0.000000e+00 : f32
    %16 = vector.broadcast %cst_10 : f32 to vector<128x128xf32>
    %17 = arith.maximumf %15, %16 : vector<128x128xf32>
    %18 = arith.truncf %17 : vector<128x128xf32> to vector<128x128xbf16>
    %c0_11 = arith.constant 0 : index
    %c0_12 = arith.constant 0 : index
    %19 = vector.load %arg6[%c0_11, %c0_12] : memref<128x128xf32, #tpu.memory_space<vmem>>, vector<128x128xf32>
    %20 = arith.truncf %19 : vector<128x128xf32> to vector<128x128xbf16>
    %cst_13 = arith.constant dense<0.000000e+00> : vector<128x128xf32>
    %21 = tpu.matmul %18, %20, %cst_13 {dimension_numbers = #tpu.dot_dimension_numbers<[1], [0], [0], [1], [0, 0, 1, 1], [], []>} : vector<128x128xbf16>, vector<128x128xbf16>, vector<128x128xf32> -> vector<128x128xf32>
    %22 = vector.broadcast %1 : vector<128x1xf32> to vector<128x128xf32>
    %23 = arith.mulf %22, %21 : vector<128x128xf32>
    %24 = arith.truncf %23 : vector<128x128xf32> to vector<128x128xbf16>
    %cst_14 = arith.constant dense<0.000000e+00> : vector<128x128xf32>
    %25 = tpu.matmul %0, %24, %cst_14 {dimension_numbers = #tpu.dot_dimension_numbers<[1], [0], [0], [1], [0, 0, 1, 1], [], []>} : vector<128x128xbf16>, vector<128x128xbf16>, vector<128x128xf32> -> vector<128x128xf32>
    %26 = vector.broadcast %1 : vector<128x1xf32> to vector<128x128xf32>
    %27 = arith.mulf %26, %25 : vector<128x128xf32>
    %c0_15 = arith.constant 0 : index
    %c0_16 = arith.constant 0 : index
    %28 = vector.load %arg7[%c0_15, %c0_16] : memref<1x128xf32, #tpu.memory_space<vmem>>, vector<1x128xf32>
    %29 = vector.broadcast %28 : vector<1x128xf32> to vector<128x128xf32>
    %30 = arith.addf %27, %29 : vector<128x128xf32>
    %cst_17 = arith.constant 0.000000e+00 : f32
    %31 = vector.broadcast %cst_17 : f32 to vector<128x128xf32>
    %32 = arith.maximumf %30, %31 : vector<128x128xf32>
    %33 = arith.truncf %32 : vector<128x128xf32> to vector<128x128xbf16>
    %c0_18 = arith.constant 0 : index
    %c0_19 = arith.constant 0 : index
    %34 = vector.load %arg8[%c0_18, %c0_19] : memref<128x128xf32, #tpu.memory_space<vmem>>, vector<128x128xf32>
    %35 = arith.truncf %34 : vector<128x128xf32> to vector<128x128xbf16>
    %cst_20 = arith.constant dense<0.000000e+00> : vector<128x128xf32>
    %36 = tpu.matmul %33, %35, %cst_20 {dimension_numbers = #tpu.dot_dimension_numbers<[1], [0], [0], [1], [0, 0, 1, 1], [], []>} : vector<128x128xbf16>, vector<128x128xbf16>, vector<128x128xf32> -> vector<128x128xf32>
    %37 = vector.broadcast %1 : vector<128x1xf32> to vector<128x128xf32>
    %38 = arith.mulf %37, %36 : vector<128x128xf32>
    %39 = arith.truncf %38 : vector<128x128xf32> to vector<128x128xbf16>
    %cst_21 = arith.constant dense<0.000000e+00> : vector<128x128xf32>
    %40 = tpu.matmul %0, %39, %cst_21 {dimension_numbers = #tpu.dot_dimension_numbers<[1], [0], [0], [1], [0, 0, 1, 1], [], []>} : vector<128x128xbf16>, vector<128x128xbf16>, vector<128x128xf32> -> vector<128x128xf32>
    %41 = vector.broadcast %1 : vector<128x1xf32> to vector<128x128xf32>
    %42 = arith.mulf %41, %40 : vector<128x128xf32>
    %c0_22 = arith.constant 0 : index
    %c0_23 = arith.constant 0 : index
    %43 = vector.load %arg9[%c0_22, %c0_23] : memref<1x128xf32, #tpu.memory_space<vmem>>, vector<1x128xf32>
    %44 = vector.broadcast %43 : vector<1x128xf32> to vector<128x128xf32>
    %45 = arith.addf %42, %44 : vector<128x128xf32>
    %c0_24 = arith.constant 0 : index
    %c0_25 = arith.constant 0 : index
    %46 = vector.load %arg10[%c0_24, %c0_25] : memref<128x128xf32, #tpu.memory_space<vmem>>, vector<128x128xf32>
    tpu.vector_store %arg10[%c0_24, %c0_25], %45 {strides = array<i32>} : memref<128x128xf32, #tpu.memory_space<vmem>>, vector<128x128xf32>,
    return
  }
  func.func @transform_0(%arg0: i32) -> (i32, i32) {
    %c0_i32 = arith.constant 0 : i32
    %c0_i32_0 = arith.constant 0 : i32
    %c0_i32_1 = arith.constant 0 : i32
    return %c0_i32, %c0_i32_0 : i32, i32
  }
  func.func @transform_1(%arg0: i32) -> (i32, i32) {
    %c0_i32 = arith.constant 0 : i32
    %c0_i32_0 = arith.constant 0 : i32
    %c0_i32_1 = arith.constant 0 : i32
    return %c0_i32, %c0_i32_0 : i32, i32
  }
  func.func @transform_2(%arg0: i32) -> (i32, i32) {
    %c0_i32 = arith.constant 0 : i32
    %c0_i32_0 = arith.constant 0 : i32
    %c0_i32_1 = arith.constant 0 : i32
    return %c0_i32, %c0_i32_0 : i32, i32
  }
  func.func @transform_3(%arg0: i32) -> (i32, i32) {
    %c0_i32 = arith.constant 0 : i32
    %c0_i32_0 = arith.constant 0 : i32
    %c0_i32_1 = arith.constant 0 : i32
    return %c0_i32, %c0_i32_0 : i32, i32
  }
  func.func @transform_4(%arg0: i32) -> (i32, i32) {
    %c0_i32 = arith.constant 0 : i32
    %c0_i32_0 = arith.constant 0 : i32
    %c0_i32_1 = arith.constant 0 : i32
    return %c0_i32, %c0_i32_0 : i32, i32
  }
  func.func @transform_5(%arg0: i32) -> (i32, i32) {
    %c0_i32 = arith.constant 0 : i32
    %c0_i32_0 = arith.constant 0 : i32
    %c0_i32_1 = arith.constant 0 : i32
    return %c0_i32, %c0_i32_0 : i32, i32
  }
  func.func @transform_6(%arg0: i32) -> (i32, i32) {
    %c0_i32 = arith.constant 0 : i32
    %c0_i32_0 = arith.constant 0 : i32
    %c0_i32_1 = arith.constant 0 : i32
    return %c0_i32, %c0_i32_0 : i32, i32
  }
  func.func @transform_7(%arg0: i32) -> (i32, i32) {
    %c0_i32 = arith.constant 0 : i32
    %c0_i32_0 = arith.constant 0 : i32
    %c0_i32_1 = arith.constant 0 : i32
    return %c0_i32, %c0_i32_0 : i32, i32
  }
  func.func @transform_8(%arg0: i32) -> (i32, i32) {
    %c0_i32 = arith.constant 0 : i32
    %c0_i32_0 = arith.constant 0 : i32
    %c0_i32_1 = arith.constant 0 : i32
    return %c0_i32, %c0_i32_0 : i32, i32
  }
  func.func @transform_9(%arg0: i32) -> (i32, i32) {
    %c0_i32 = arith.constant 0 : i32
    %c0_i32_0 = arith.constant 0 : i32
    %c0_i32_1 = arith.constant 0 : i32
    return %c0_i32, %c0_i32_0 : i32, i32
  }
}

</mosaic_0001>

<bundles_post_ra>
// kernel: gcn_forward.3
= control target key start
LH: loop header
LB: loop body
LE: loop exit
PB: predicated region body
PF: predicated region fallthrough
CT: control target
= control target key end

     0   :  { %s210_s0 = inlined_call_operand.vmem [shape: f32[128,128], index: 0, kind: input, shape index: {}]   ;;  %s211_s1 = inlined_call_operand.vmem [shape: f32[128,128], index: 1, kind: input, shape index: {}]   ;;  %s212_s2 = inlined_call_operand.vmem [shape: f32[1,128], index: 2, kind: output, shape index: {}]  }
   0x1   :  { %v11_v0 = vld [vmem:[%s210_s0] sm:$0xff]  ;;  %v12_v1 = vld [vmem:[%s210_s0 + $0x8] sm:$0xff]  ;;  %v13_v2 = vld [vmem:[%s210_s0 + $0x10] sm:$0xff] }
   0x2   :  { %v14_v3 = vld [vmem:[%s210_s0 + $0x18] sm:$0xff]  ;;  %v27_v4 = vld [vmem:[%s211_s1] sm:$0xff]  ;;  %v28_v5 = vld [vmem:[%s211_s1 + $0x8] sm:$0xff] }
   0x3   :  { %v29_v6 = vld [vmem:[%s211_s1 + $0x10] sm:$0xff]  ;;  %v30_v7 = vld [vmem:[%s211_s1 + $0x18] sm:$0xff]  ;;  %v43_v8 = vmul.f32 %v27_v4, %v11_v0  ;;  %v44_v9 = vmul.f32 %v28_v5, %v12_v1  ;;  %v15_v10 = vld [vmem:[%s210_s0 + $0x20] sm:$0xff] }
   0x4   :  { %v31_v11 = vld [vmem:[%s211_s1 + $0x20] sm:$0xff]  ;;  %v45_v12 = vmul.f32 %v29_v6, %v13_v2  ;;  %v46_v13 = vmul.f32 %v30_v7, %v14_v3  ;;  %v16_v15 = vld [vmem:[%s210_s0 + $0x28] sm:$0xff]  ;;  %v17_v19 = vld [vmem:[%s210_s0 + $0x30] sm:$0xff] }
   0x5   :  { %v59_v14 = vadd.f32 %v44_v9, %v43_v8  ;;  %v32_v16 = vld [vmem:[%s211_s1 + $0x28] sm:$0xff]  ;;  %v47_v17 = vmul.f32 %v31_v11, %v15_v10  ;;  %v33_v20 = vld [vmem:[%s211_s1 + $0x30] sm:$0xff]  ;;  %v18_v23 = vld [vmem:[%s210_s0 + $0x38] sm:$0xff] }
   0x6   :  { %v48_v21 = vmul.f32 %v32_v16, %v16_v15  ;;  %v34_v24 = vld [vmem:[%s211_s1 + $0x38] sm:$0xff]  ;;  %v49_v25 = vmul.f32 %v33_v20, %v17_v19  ;;  %v19_v27 = vld [vmem:[%s210_s0 + $0x40] sm:$0xff]  ;;  %v20_v31 = vld [vmem:[%s210_s0 + $0x48] sm:$0xff] }
   0x7   :  { %v60_v18 = vadd.f32 %v59_v14, %v45_v12  ;;  %v35_v28 = vld [vmem:[%s211_s1 + $0x40] sm:$0xff]  ;;  %v50_v29 = vmul.f32 %v34_v24, %v18_v23  ;;  %v36_v32 = vld [vmem:[%s211_s1 + $0x48] sm:$0xff]  ;;  %v21_v35 = vld [vmem:[%s210_s0 + $0x50] sm:$0xff] }
   0x8   :  { %v51_v33 = vmul.f32 %v35_v28, %v19_v27  ;;  %v37_v36 = vld [vmem:[%s211_s1 + $0x50] sm:$0xff]  ;;  %v52_v37 = vmul.f32 %v36_v32, %v20_v31  ;;  %v22_v39 = vld [vmem:[%s210_s0 + $0x58] sm:$0xff]  ;;  %v23_v43 = vld [vmem:[%s210_s0 + $0x60] sm:$0xff] }
   0x9   :  { %v61_v22 = vadd.f32 %v60_v18, %v46_v13  ;;  %v38_v40 = vld [vmem:[%s211_s1 + $0x58] sm:$0xff]  ;;  %v53_v41 = vmul.f32 %v37_v36, %v21_v35  ;;  %v39_v44 = vld [vmem:[%s211_s1 + $0x60] sm:$0xff]  ;;  %v24_v47 = vld [vmem:[%s210_s0 + $0x68] sm:$0xff] }
   0xa   :  { %v54_v45 = vmul.f32 %v38_v40, %v22_v39  ;;  %v40_v48 = vld [vmem:[%s211_s1 + $0x68] sm:$0xff]  ;;  %v55_v49 = vmul.f32 %v39_v44, %v23_v43  ;;  %v25_v51 = vld [vmem:[%s210_s0 + $0x70] sm:$0xff]  ;;  %v26_v55 = vld [vmem:[%s210_s0 + $0x78] sm:$0xff] }
   0xb   :  { %v62_v26 = vadd.f32 %v61_v22, %v47_v17  ;;  %v41_v52 = vld [vmem:[%s211_s1 + $0x70] sm:$0xff]  ;;  %v56_v53 = vmul.f32 %v40_v48, %v24_v47  ;;  %v42_v56 = vld [vmem:[%s211_s1 + $0x78] sm:$0xff] }
   0xc   :  { %v57_v57 = vmul.f32 %v41_v52, %v25_v51  ;;  %v58_v59 = vmul.f32 %v42_v56, %v26_v55 }
   0xd   :  { %v63_v30 = vadd.f32 %v62_v26, %v48_v21 }
   0xf   :  { %v64_v34 = vadd.f32 %v63_v30, %v49_v25 }
  0x11   :  { %v65_v38 = vadd.f32 %v64_v34, %v50_v29 }
  0x13   :  { %v66_v42 = vadd.f32 %v65_v38, %v51_v33 }
  0x15   :  { %v67_v46 = vadd.f32 %v66_v42, %v52_v37 }
  0x17   :  { %v68_v50 = vadd.f32 %v67_v46, %v53_v41 }
  0x19   :  { %v69_v54 = vadd.f32 %v68_v50, %v54_v45 }
  0x1b   :  { %v70_v58 = vadd.f32 %v69_v54, %v55_v49 }
  0x1d   :  { %v71_v60 = vadd.f32 %v70_v58, %v56_v53 }
  0x1f   :  { %v72_v61 = vadd.f32 %v71_v60, %v57_v57 }
  0x21   :  { %v73_v62 = vadd.f32 %v72_v61, %v58_v59 }
  0x23   :  { %v74_v63 = vrot.slane %v73_v62, 4 }
  0x25   :  { %v75_v0 = vadd.f32 %v74_v63, %v73_v62 }
  0x27   :  { %v76_v1 = vrot.slane %v75_v0, 2 }
  0x29   :  { %v77_v2 = vadd.f32 %v76_v1, %v75_v0 }
  0x2b   :  { %v78_v3 = vrot.slane %v77_v2, 1 }
  0x2d   :  { %v79_v4 = vadd.f32 %v78_v3, %v77_v2 }
  0x2f   :  { %v91_v5 = vmul.f32 -1.442695, %v79_v4 }
  0x31   :  { %92 = vpow2.f32 %v91_v5 }
  0x3e   :  { %v93_v6 = vpop.eup %92 }
  0x3f   :  { %v83_v7 = vadd.f32 1.0, %v93_v6 }
  0x41   :  { %94 = vrcp.f32 %v83_v7 }
  0x4e   :  { %v95_v8 = vpop.eup %94 }
  0x4f   :  { %86 = vst [vmem:[%s212_s2] sm:$0x1] %v95_v8 }

// kernel: gcn_forward.2
= control target key start
LH: loop header
LB: loop body
LE: loop exit
PB: predicated region body
PF: predicated region fallthrough
CT: control target
= control target key end

     0   :  { %v1438_v3 = vmov 0   ;;  %s2035_s3 = inlined_call_operand.vmem [shape: f32[128,128], index: 3, kind: input, shape index: {}]   ;;  %s2036_s2 = inlined_call_operand.vmem [shape: f32[128,128], index: 2, kind: input, shape index: {}]   ;;  %s2037_s1 = inlined_call_operand.vmem [shape: f32[128,1], index: 1, kind: input, shape index: {}]   ;;  %s2038_s0 = inlined_call_operand.vmem [shape: bf16[128,128], index: 0, kind: input, shape index: {}]   ;;  %s2039_s5 = inlined_call_operand.vmem [shape: f32[128,128], index: 5, kind: input, shape index: {}]   ;;  %s2040_s4 = inlined_call_operand.vmem [shape: f32[1,128], index: 4, kind: input, shape index: {}]   ;;  %s2041_s7 = inlined_call_operand.vmem [shape: f32[128,128], index: 7, kind: input, shape index: {}]   ;;  %s2042_s6 = inlined_call_operand.vmem [shape: f32[1,128], index: 6, kind: input, shape index: {}]   ;;  %s2043_s8 = inlined_call_operand.vmem [shape: f32[1,128], index: 8, kind: input, shape index: {}]   ;;  %s2044_s9 = inlined_call_operand.vmem [shape: f32[128,128], index: 9, kind: output, shape index: {}]  }
   0x1   :  { %v103_v0 = vld [vmem:[%s2035_s3 + $0x70] sm:$0xff]  ;;  %v104_v1 = vld [vmem:[%s2035_s3 + $0x78] sm:$0xff]  ;;  %v101_v2 = vld [vmem:[%s2035_s3 + $0x60] sm:$0xff]  ;;  %1428 = vset.pattern.permute.xlu0 %v1438_v3  ;;  %1429 = vset.pattern.permute.xlu1 %v1438_v3 }
   0x2   :  { %v112_v4 = vpack.c.bf16 %v104_v1, %v103_v0  ;;  %v102_v5 = vld [vmem:[%s2035_s3 + $0x68] sm:$0xff]  ;;  %v99_v7 = vld [vmem:[%s2035_s3 + $0x50] sm:$0xff]  ;;  %v100_v8 = vld [vmem:[%s2035_s3 + $0x58] sm:$0xff] }
   0x3   :  { %v111_v6 = vpack.c.bf16 %v102_v5, %v101_v2  ;;  %v110_v9 = vpack.c.bf16 %v100_v8, %v99_v7  ;;  %v65_v10 = vld [vmem:[%s2036_s2] sm:$0xff]  ;;  %v66_v11 = vld [vmem:[%s2036_s2 + $0x8] sm:$0xff]  ;;  %v95_v16 = vld [vmem:[%s2035_s3 + $0x30] sm:$0xff] }
   0x4   :  { %1235 = vmatprep.subr.bf16.mxu0 %v112_v4  ;;  %v97_v12 = vld [vmem:[%s2035_s3 + $0x40] sm:$0xff]  ;;  %v98_v13 = vld [vmem:[%s2035_s3 + $0x48] sm:$0xff]  ;;  %v81_v14 = vpack.c.bf16 %v66_v11, %v65_v10  ;;  %v96_v17 = vld [vmem:[%s2035_s3 + $0x38] sm:$0xff] }
   0x5   :  { %1236 = vmatpush3.bf16.msra.mxu0 %v112_v4  ;;  %v109_v15 = vpack.c.bf16 %v98_v13, %v97_v12  ;;  %v63_v18 = vld [vmem:[%s2037_s1 + $0x70] sm:$0xff]  ;;  %v61_v19 = vld [vmem:[%s2037_s1 + $0x60] sm:$0xff]  ;;  %v64_v20 = vld [vmem:[%s2037_s1 + $0x78] sm:$0xff]  ;;  %v108_v21 = vpack.c.bf16 %v96_v17, %v95_v16 }
   0x6   :  { %1237 = vmatprep.subr.bf16.mxu0 %v111_v6  ;;  %1251 = vmatprep.mubr.bf16.mxu0 %v81_v14  ;;  %v62_v22 = vld [vmem:[%s2037_s1 + $0x68] sm:$0xff]  ;;  %v93_v23 = vld [vmem:[%s2035_s3 + $0x20] sm:$0xff]  ;;  %v59_v25 = vld [vmem:[%s2037_s1 + $0x50] sm:$0xff] }
   0x7   :  { %282 = vperm.xlu0 %1428, %v63_v18   ;;  %272 = vperm.xlu1 %1429, %v61_v19   ;;  %v94_v24 = vld [vmem:[%s2035_s3 + $0x28] sm:$0xff]  ;;  %v60_v27 = vld [vmem:[%s2037_s1 + $0x58] sm:$0xff]  ;;  %v91_v28 = vld [vmem:[%s2035_s3 + $0x10] sm:$0xff] }
   0x8   :  { %v107_v26 = vpack.c.bf16 %v94_v24, %v93_v23  ;;  %v92_v29 = vld [vmem:[%s2035_s3 + $0x18] sm:$0xff]  ;;  %v57_v30 = vld [vmem:[%s2037_s1 + $0x40] sm:$0xff]  ;;  %v58_v32 = vld [vmem:[%s2037_s1 + $0x48] sm:$0xff] }
   0x9   :  { %1238 = vmatpush3.bf16.msra.mxu0 %v111_v6  ;;  %v106_v31 = vpack.c.bf16 %v92_v29, %v91_v28  ;;  %v89_v33 = vld [vmem:[%s2035_s3] sm:$0xff]  ;;  %v90_v34 = vld [vmem:[%s2035_s3 + $0x8] sm:$0xff]  ;;  %v55_v35 = vld [vmem:[%s2037_s1 + $0x30] sm:$0xff] }
   0xa   :  { %1239 = vmatprep.subr.bf16.mxu0 %v110_v9  ;;  %v105_v36 = vpack.c.bf16 %v90_v34, %v89_v33  ;;  %v56_v37 = vld [vmem:[%s2037_s1 + $0x38] sm:$0xff]  ;;  %v67_v38 = vld [vmem:[%s2036_s2 + $0x10] sm:$0xff]  ;;  %v53_v40 = vld [vmem:[%s2037_s1 + $0x20] sm:$0xff] }
   0xb   :  { %287 = vperm.xlu0 %1428, %v64_v20   ;;  %277 = vperm.xlu1 %1429, %v62_v22   ;;  %v68_v39 = vld [vmem:[%s2036_s2 + $0x18] sm:$0xff]  ;;  %v69_v41 = vld [vmem:[%s2036_s2 + $0x20] sm:$0xff]  ;;  %v70_v42 = vld [vmem:[%s2036_s2 + $0x28] sm:$0xff] }
   0xc   :  { %v54_v43 = vld [vmem:[%s2037_s1 + $0x28] sm:$0xff]  ;;  %v82_v44 = vpack.c.bf16 %v68_v39, %v67_v38  ;;  %v83_v45 = vpack.c.bf16 %v70_v42, %v69_v41  ;;  %v51_v46 = vld [vmem:[%s2037_s1 + $0x10] sm:$0xff]  ;;  %v52_v47 = vld [vmem:[%s2037_s1 + $0x18] sm:$0xff] }
   0xd   :  { %1240 = vmatpush3.bf16.msra.mxu0 %v110_v9  ;;  %v71_v48 = vld [vmem:[%s2036_s2 + $0x30] sm:$0xff]  ;;  %v72_v49 = vld [vmem:[%s2036_s2 + $0x38] sm:$0xff]  ;;  %v49_v50 = vld [vmem:[%s2037_s1] sm:$0xff] }
   0xe   :  { %1241 = vmatprep.subr.bf16.mxu0 %v109_v15  ;;  %v73_v51 = vld [vmem:[%s2036_s2 + $0x40] sm:$0xff]  ;;  %v74_v52 = vld [vmem:[%s2036_s2 + $0x48] sm:$0xff]  ;;  %v84_v54 = vpack.c.bf16 %v72_v49, %v71_v48  ;;  %v75_v56 = vld [vmem:[%s2036_s2 + $0x50] sm:$0xff] }
   0xf   :  { %262 = vperm.xlu0 %1428, %v59_v25   ;;  %267 = vperm.xlu1 %1429, %v60_v27   ;;  %v50_v53 = vld [vmem:[%s2037_s1 + $0x8] sm:$0xff]  ;;  %v85_v55 = vpack.c.bf16 %v74_v52, %v73_v51  ;;  %v76_v57 = vld [vmem:[%s2036_s2 + $0x58] sm:$0xff]  ;;  %v77_v58 = vld [vmem:[%s2036_s2 + $0x60] sm:$0xff] }
  0x10   :  { %v78_v59 = vld [vmem:[%s2036_s2 + $0x68] sm:$0xff]  ;;  %v86_v60 = vpack.c.bf16 %v76_v57, %v75_v56  ;;  %v79_v62 = vld [vmem:[%s2036_s2 + $0x70] sm:$0xff]  ;;  %v80_v63 = vld [vmem:[%s2036_s2 + $0x78] sm:$0xff] }
  0x11   :  { %1242 = vmatpush3.bf16.msra.mxu0 %v109_v15  ;;  %v87_v61 = vpack.c.bf16 %v78_v59, %v77_v58  ;;  %v88_v0 = vpack.c.bf16 %v80_v63, %v79_v62  ;;  %v1636_v1 = vld [vmem:[%s2038_s0] sm:$0xff]   ;;  %v536_v2 = vld [vmem:[%s2039_s5 + $0x70] sm:$0xff]  ;;  %v537_v3 = vld [vmem:[%s2039_s5 + $0x78] sm:$0xff] }
  0x12   :  { %1243 = vmatprep.subr.bf16.mxu0 %v108_v21  ;;  %1283 = vmatprep.mubr.bf16.mxu1 %v1636_v1  ;;  %v534_v4 = vld [vmem:[%s2039_s5 + $0x60] sm:$0xff]  ;;  %v545_v5 = vpack.c.bf16 %v537_v3, %v536_v2  ;;  %v535_v6 = vld [vmem:[%s2039_s5 + $0x68] sm:$0xff]  ;;  %v532_v8 = vld [vmem:[%s2039_s5 + $0x50] sm:$0xff] }
  0x13   :  { %252 = vperm.xlu0 %1428, %v57_v30   ;;  %257 = vperm.xlu1 %1429, %v58_v32   ;;  %v544_v7 = vpack.c.bf16 %v535_v6, %v534_v4  ;;  %v533_v9 = vld [vmem:[%s2039_s5 + $0x58] sm:$0xff]  ;;  %v530_v11 = vld [vmem:[%s2039_s5 + $0x40] sm:$0xff]  ;;  %v531_v12 = vld [vmem:[%s2039_s5 + $0x48] sm:$0xff] }
  0x14   :  { %v543_v10 = vpack.c.bf16 %v533_v9, %v532_v8  ;;  %v542_v13 = vpack.c.bf16 %v531_v12, %v530_v11  ;;  %v1722_v8 = vld [vmem:[%s2038_s0 + $0x10] sm:$0xff]   ;;  %v1729_v9 = vld [vmem:[%s2038_s0 + $0x18] sm:$0xff]   ;;  %v1741_v11 = vld [vmem:[%s2038_s0 + $0x28] sm:$0xff]  }
  0x15   :  { %1244 = vmatpush3.bf16.msra.mxu0 %v108_v21  ;;  %v1746_v12 = vld [vmem:[%s2038_s0 + $0x30] sm:$0xff]  }
  0x16   :  { %1245 = vmatprep.subr.bf16.mxu0 %v107_v26 }
  0x17   :  { %242 = vperm.xlu0 %1428, %v55_v35   ;;  %247 = vperm.xlu1 %1429, %v56_v37  }
  0x19   :  { %1246 = vmatpush3.bf16.msra.mxu0 %v107_v26 }
  0x1a   :  { %1247 = vmatprep.subr.bf16.mxu0 %v106_v31 }
  0x1b   :  { %232 = vperm.xlu0 %1428, %v53_v40   ;;  %237 = vperm.xlu1 %1429, %v54_v43  }
  0x1d   :  { %1248 = vmatpush3.bf16.msra.mxu0 %v106_v31 }
  0x1e   :  { %1249 = vmatprep.subr.bf16.mxu0 %v105_v36 }
  0x1f   :  { %222 = vperm.xlu0 %1428, %v51_v46   ;;  %227 = vperm.xlu1 %1429, %v52_v47  }
  0x21   :  { %1250 = vmatpush3.bf16.msra.mxu0 %v105_v36 }
  0x22   :  { %1299 = vmatprep.subr.bf16.mxu0 %v545_v5 }
  0x23   :  { %212 = vperm.xlu0 %1428, %v49_v50   ;;  %217 = vperm.xlu1 %1429, %v50_v53  }
  0x24   :  { %1252 = vmatmul.mubr.bf16.vlgmr.msra.gmra.mxu0 %v82_v44 }
  0x25   :  { %1255 = vmatprep.mubr.bf16.mxu0 %v83_v45  ;;  %1300 = vmatpush3.bf16.msra.mxu0 %v545_v5 }
  0x26   :  { %1301 = vmatprep.subr.bf16.mxu0 %v544_v7 }
  0x29   :  { %1302 = vmatpush3.bf16.msra.mxu0 %v544_v7  ;;  %v1717_v7 = vld [vmem:[%s2038_s0 + $0x8] sm:$0xff]  }
  0x2a   :  { %1303 = vmatprep.subr.bf16.mxu0 %v543_v10 }
  0x2c   :  { %1256 = vmatmul.mubr.bf16.gmra.mxu0 %v84_v54 }
  0x2d   :  { %1259 = vmatprep.mubr.bf16.mxu0 %v85_v55  ;;  %1304 = vmatpush3.bf16.msra.mxu0 %v543_v10  ;;  %v1734_v10 = vld [vmem:[%s2038_s0 + $0x20] sm:$0xff]  }
  0x2e   :  { %1305 = vmatprep.subr.bf16.mxu0 %v542_v13 }
  0x31   :  { %1306 = vmatpush3.bf16.msra.mxu0 %v542_v13  ;;  %v1753_v13 = vld [vmem:[%s2038_s0 + $0x38] sm:$0xff]  }
  0x34   :  { %1260 = vmatmul.mubr.bf16.gmra.mxu0 %v86_v60 }
  0x35   :  { %1263 = vmatprep.mubr.bf16.mxu0 %v87_v61 }
  0x3c   :  { %1264 = vmatmul.mubr.bf16.gmra.mxu0 %v88_v0 }
  0x82   :  { %v1665_v18 = vpop.permute.xlu1 %272  ;;  %v1667_v20 = vpop.permute.xlu0 %282 }
  0x86   :  { %v1669_v23 = vpop.permute.xlu1 %277  ;;  %v1671_v25 = vpop.permute.xlu0 %287 }
  0x8a   :  { %v1673_v28 = vpop.permute.xlu1 %267  ;;  %v1675_v30 = vpop.permute.xlu0 %262 }
  0x8e   :  { %v1677_v33 = vpop.permute.xlu1 %257  ;;  %v1679_v35 = vpop.permute.xlu0 %252 }
  0x92   :  { %v1685_v43 = vpop.permute.xlu1 %247  ;;  %v1688_v46 = vpop.permute.xlu0 %242 }
  0x96   :  { %v1692_v50 = vpop.permute.xlu1 %237  ;;  %v1695_v52 = vpop.permute.xlu0 %232 }
  0x9a   :  { %v1699_v56 = vpop.permute.xlu1 %227  ;;  %v1702_v59 = vpop.permute.xlu0 %222 }
  0x9e   :  { %v1706_v63 = vpop.permute.xlu1 %217  ;;  %v1709_v2 = vpop.permute.xlu0 %212 }
  0xe4   :  { %v1253_v14 = vpop.f32.mrf.mxu0 }
  0xe5   :  { %v292_v0 = vmul.f32 %v1253_v14, %v1702_v59  ;;  %v528_v14 = vld [vmem:[%s2039_s5 + $0x30] sm:$0xff] }
  0xe6   :  { %v1663_v15 = vpop.f32.mrf.mxu0 }
  0xe7   :  { %v290_v5 = vmul.f32 %v1709_v2, %v1663_v15  ;;  %v529_v15 = vld [vmem:[%s2039_s5 + $0x38] sm:$0xff] }
  0xe8   :  { %v1254_v16 = vpop.f32.mrf.mxu0 }
  0xe9   :  { %v293_v61 = vmul.f32 %v1254_v16, %v1699_v56  ;;  %v541_v16 = vpack.c.bf16 %v529_v15, %v528_v14 }
  0xea   :  { %v150_v17 = vpop.f32.mrf.mxu0 }
  0xeb   :  { %v307_v3 = vpack.c.bf16 %v293_v61, %v292_v0  ;;  %v291_v4 = vmul.f32 %v1706_v63, %v150_v17  ;;  %1307 = vmatprep.subr.bf16.mxu0 %v541_v16  ;;  %v526_v17 = vld [vmem:[%s2039_s5 + $0x20] sm:$0xff] }
  0xec   :  { %v1257_v19 = vpop.f32.mrf.mxu0  ;;  %1308 = vmatpush3.bf16.msra.mxu0 %v541_v16 }
  0xed   :  { %v296_v55 = vmul.f32 %v1257_v19, %v1688_v46  ;;  %v306_v6 = vpack.c.bf16 %v291_v4, %v290_v5  ;;  %v527_v19 = vld [vmem:[%s2039_s5 + $0x28] sm:$0xff] }
  0xee   :  { %v163_v21 = vpop.f32.mrf.mxu0 }
  0xef   :  { %v294_v60 = vmul.f32 %v1695_v52, %v163_v21  ;;  %v540_v21 = vpack.c.bf16 %v527_v19, %v526_v17 }
  0xf0   :  { %v1258_v22 = vpop.f32.mrf.mxu0 }
  0xf1   :  { %v297_v53 = vmul.f32 %v1258_v22, %v1685_v43  ;;  %1309 = vmatprep.subr.bf16.mxu0 %v540_v21  ;;  %v524_v22 = vld [vmem:[%s2039_s5 + $0x10] sm:$0xff] }
  0xf2   :  { %v166_v24 = vpop.f32.mrf.mxu0  ;;  %1310 = vmatpush3.bf16.msra.mxu0 %v540_v21 }
  0xf3   :  { %v309_v57 = vpack.c.bf16 %v297_v53, %v296_v55  ;;  %v295_v58 = vmul.f32 %v1692_v50, %v166_v24  ;;  %v525_v24 = vld [vmem:[%s2039_s5 + $0x18] sm:$0xff] }
  0xf4   :  { %v1261_v26 = vpop.f32.mrf.mxu0 }
  0xf5   :  { %v300_v47 = vmul.f32 %v1261_v26, %v1675_v30  ;;  %v308_v62 = vpack.c.bf16 %v295_v58, %v294_v60  ;;  %v539_v26 = vpack.c.bf16 %v525_v24, %v524_v22 }
  0xf6   :  { %v179_v27 = vpop.f32.mrf.mxu0 }
  0xf7   :  { %v298_v51 = vmul.f32 %v1679_v35, %v179_v27  ;;  %1311 = vmatprep.subr.bf16.mxu0 %v539_v26  ;;  %v522_v27 = vld [vmem:[%s2039_s5] sm:$0xff] }
  0xf8   :  { %v1262_v29 = vpop.f32.mrf.mxu0  ;;  %1312 = vmatpush3.bf16.msra.mxu0 %v539_v26 }
  0xf9   :  { %v301_v44 = vmul.f32 %v1262_v29, %v1673_v28  ;;  %v523_v29 = vld [vmem:[%s2039_s5 + $0x8] sm:$0xff] }
  0xfa   :  { %v182_v31 = vpop.f32.mrf.mxu0 }
  0xfb   :  { %v311_v48 = vpack.c.bf16 %v301_v44, %v300_v47  ;;  %v299_v49 = vmul.f32 %v1677_v33, %v182_v31  ;;  %v538_v31 = vpack.c.bf16 %v523_v29, %v522_v27 }
  0xfc   :  { %v1265_v32 = vpop.f32.mrf.mxu0 }
  0xfd   :  { %v304_v37 = vmul.f32 %v1265_v32, %v1667_v20  ;;  %v310_v54 = vpack.c.bf16 %v299_v49, %v298_v51  ;;  %1313 = vmatprep.subr.bf16.mxu0 %v538_v31 }
  0xfe   :  { %v195_v34 = vpop.f32.mrf.mxu0  ;;  %1314 = vmatpush3.bf16.msra.mxu0 %v538_v31 }
  0xff   :  { %v302_v40 = vmul.f32 %v1665_v18, %v195_v34 }
 0x100   :  { %v1266_v36 = vpop.f32.mrf.mxu0 }
 0x101   :  { %v305_v38 = vmul.f32 %v1266_v36, %v1671_v25 }
 0x102   :  { %v198_v39 = vpop.f32.mrf.mxu0 }
 0x103   :  { %v303_v41 = vmul.f32 %v1669_v23, %v198_v39  ;;  %v313_v42 = vpack.c.bf16 %v305_v38, %v304_v37  ;;  %v1786_v39 = vld [vmem:[%s2040_s4] ss:$0 sm:$0xff] }
 0x105   :  { %v312_v45 = vpack.c.bf16 %v303_v41, %v302_v40  ;;  %1267 = vmatprep.subr.bf16.mxu1 %v313_v42 }
 0x106   :  { %1268 = vmatpush3.bf16.msra.mxu1 %v313_v42 }
 0x107   :  { %1269 = vmatprep.subr.bf16.mxu1 %v312_v45 }
 0x10a   :  { %1270 = vmatpush3.bf16.msra.mxu1 %v312_v45 }
 0x10b   :  { %1271 = vmatprep.subr.bf16.mxu1 %v311_v48 }
 0x10e   :  { %1272 = vmatpush3.bf16.msra.mxu1 %v311_v48 }
 0x10f   :  { %1273 = vmatprep.subr.bf16.mxu1 %v310_v54 }
 0x112   :  { %1274 = vmatpush3.bf16.msra.mxu1 %v310_v54 }
 0x113   :  { %1275 = vmatprep.subr.bf16.mxu1 %v309_v57 }
 0x116   :  { %1276 = vmatpush3.bf16.msra.mxu1 %v309_v57 }
 0x117   :  { %1277 = vmatprep.subr.bf16.mxu1 %v308_v62 }
 0x11a   :  { %1278 = vmatpush3.bf16.msra.mxu1 %v308_v62 }
 0x11b   :  { %1279 = vmatprep.subr.bf16.mxu1 %v307_v3 }
 0x11e   :  { %1280 = vmatpush3.bf16.msra.mxu1 %v307_v3 }
 0x11f   :  { %1281 = vmatprep.subr.bf16.mxu1 %v306_v6 }
 0x122   :  { %1282 = vmatpush3.bf16.msra.mxu1 %v306_v6 }
 0x125   :  { %1284 = vmatmul.mubr.bf16.vlgmr.msra.gmra.mxu1 %v1717_v7 }
 0x126   :  { %1287 = vmatprep.mubr.bf16.mxu1 %v1722_v8 }
 0x12d   :  { %1288 = vmatmul.mubr.bf16.gmra.mxu1 %v1729_v9 }
 0x12e   :  { %1291 = vmatprep.mubr.bf16.mxu1 %v1734_v10 }
 0x135   :  { %1292 = vmatmul.mubr.bf16.gmra.mxu1 %v1741_v11 }
 0x136   :  { %1295 = vmatprep.mubr.bf16.mxu1 %v1746_v12 }
 0x13d   :  { %1296 = vmatmul.mubr.bf16.gmra.mxu1 %v1753_v13 }
 0x13e   :  { %1347 = vmatprep.mubr.bf16.mxu1 %v1636_v1 }
 0x1e5   :  { %v1285_v32 = vpop.f32.mrf.mxu1 }
 0x1e6   :  { %v461_v37 = vmul.f32 %v1285_v32, %v1702_v59 }
 0x1e7   :  { %v396_v34 = vpop.f32.mrf.mxu1 }
 0x1e8   :  { %v459_v36 = vmul.f32 %v396_v34, %v1709_v2  ;;  %v484_v47 = vadd.f32 %v1786_v39, %v461_v37 }
 0x1e9   :  { %v1286_v38 = vpop.f32.mrf.mxu1 }
 0x1ea   :  { %v462_v40 = vmul.f32 %v1286_v38, %v1699_v56  ;;  %v482_v42 = vadd.f32 %v1786_v39, %v459_v36  ;;  %v500_v58 = vmax.f32 %v484_v47, 0.0 }
 0x1eb   :  { %v399_v41 = vpop.f32.mrf.mxu1 }
 0x1ec   :  { %v485_v44 = vadd.f32 %v1786_v39, %v462_v40  ;;  %v460_v45 = vmul.f32 %v399_v41, %v1706_v63  ;;  %v498_v54 = vmax.f32 %v482_v42, 0.0 }
 0x1ed   :  { %v1289_v48 = vpop.f32.mrf.mxu1 }
 0x1ee   :  { %v483_v49 = vadd.f32 %v1786_v39, %v460_v45  ;;  %v501_v51 = vmax.f32 %v485_v44, 0.0  ;;  %v465_v60 = vmul.f32 %v1289_v48, %v1688_v46 }
 0x1ef   :  { %v412_v53 = vpop.f32.mrf.mxu1 }
 0x1f0   :  { %v499_v55 = vmax.f32 %v483_v49, 0.0  ;;  %v463_v57 = vmul.f32 %v412_v53, %v1695_v52  ;;  %v515_v3 = vpack.c.bf16 %v501_v51, %v500_v58  ;;  %v488_v15 = vadd.f32 %v1786_v39, %v465_v60 }
 0x1f1   :  { %v1290_v61 = vpop.f32.mrf.mxu1 }
 0x1f2   :  { %v466_v62 = vmul.f32 %v1290_v61, %v1685_v43  ;;  %v514_v0 = vpack.c.bf16 %v499_v55, %v498_v54  ;;  %v486_v5 = vadd.f32 %v1786_v39, %v463_v57  ;;  %v504_v27 = vmax.f32 %v488_v15, 0.0 }
 0x1f3   :  { %v415_v4 = vpop.f32.mrf.mxu1 }
 0x1f4   :  { %v489_v6 = vadd.f32 %v1786_v39, %v466_v62  ;;  %v464_v14 = vmul.f32 %v415_v4, %v1692_v50  ;;  %1315 = vmatprep.mubr.bf16.mxu0 %v514_v0  ;;  %v502_v22 = vmax.f32 %v486_v5, 0.0 }
 0x1f5   :  { %v1293_v16 = vpop.f32.mrf.mxu1  ;;  %1316 = vmatmul.mubr.bf16.vlgmr.msra.gmra.mxu0 %v515_v3 }
 0x1f6   :  { %v487_v17 = vadd.f32 %v1786_v39, %v464_v14  ;;  %v505_v19 = vmax.f32 %v489_v6, 0.0  ;;  %v469_v29 = vmul.f32 %v1293_v16, %v1675_v30 }
 0x1f7   :  { %v428_v21 = vpop.f32.mrf.mxu1 }
 0x1f8   :  { %v503_v24 = vmax.f32 %v487_v17, 0.0  ;;  %v467_v26 = vmul.f32 %v428_v21, %v1679_v35  ;;  %v517_v37 = vpack.c.bf16 %v505_v19, %v504_v27  ;;  %v492_v42 = vadd.f32 %v1786_v39, %v469_v29  ;;  %v840_v27 = vld [vmem:[%s2041_s7 + $0x68] sm:$0xff] }
 0x1f9   :  { %v1294_v31 = vpop.f32.mrf.mxu1 }
 0x1fa   :  { %v470_v32 = vmul.f32 %v1294_v31, %v1673_v28  ;;  %v516_v34 = vpack.c.bf16 %v503_v24, %v502_v22  ;;  %v490_v38 = vadd.f32 %v1786_v39, %v467_v26  ;;  %v508_v54 = vmax.f32 %v492_v42, 0.0  ;;  %v841_v22 = vld [vmem:[%s2041_s7 + $0x70] sm:$0xff]  ;;  %v842_v24 = vld [vmem:[%s2041_s7 + $0x78] sm:$0xff] }
 0x1fb   :  { %v431_v36 = vpop.f32.mrf.mxu1  ;;  %v850_v26 = vpack.c.bf16 %v842_v24, %v841_v22  ;;  %v837_v31 = vld [vmem:[%s2041_s7 + $0x50] sm:$0xff] }
 0x1fc   :  { %v493_v40 = vadd.f32 %v1786_v39, %v470_v32  ;;  %v468_v41 = vmul.f32 %v431_v36, %v1677_v33  ;;  %1319 = vmatprep.mubr.bf16.mxu0 %v516_v34  ;;  %v506_v49 = vmax.f32 %v490_v38, 0.0  ;;  %v838_v32 = vld [vmem:[%s2041_s7 + $0x58] sm:$0xff]  ;;  %v835_v36 = vld [vmem:[%s2041_s7 + $0x40] sm:$0xff] }
 0x1fd   :  { %v1297_v44 = vpop.f32.mrf.mxu1  ;;  %1320 = vmatmul.mubr.bf16.gmra.mxu0 %v517_v37  ;;  %1363 = vmatprep.subr.bf16.mxu0 %v850_v26  ;;  %v848_v34 = vpack.c.bf16 %v838_v32, %v837_v31  ;;  %v836_v37 = vld [vmem:[%s2041_s7 + $0x48] sm:$0xff] }
 0x1fe   :  { %v491_v45 = vadd.f32 %v1786_v39, %v468_v41  ;;  %v509_v47 = vmax.f32 %v493_v40, 0.0  ;;  %v473_v55 = vmul.f32 %v1297_v44, %v1667_v20  ;;  %1364 = vmatpush3.bf16.msra.mxu0 %v850_v26  ;;  %v847_v38 = vpack.c.bf16 %v836_v37, %v835_v36 }
 0x1ff   :  { %v444_v48 = vpop.f32.mrf.mxu1 }
 0x200   :  { %v507_v51 = vmax.f32 %v491_v45, 0.0  ;;  %v471_v53 = vmul.f32 %v444_v48, %v1665_v18  ;;  %v519_v62 = vpack.c.bf16 %v509_v47, %v508_v54  ;;  %v496_v5 = vadd.f32 %v1786_v39, %v473_v55 }
 0x201   :  { %v1298_v57 = vpop.f32.mrf.mxu1 }
 0x202   :  { %v474_v58 = vmul.f32 %v1298_v57, %v1671_v25  ;;  %v518_v60 = vpack.c.bf16 %v507_v51, %v506_v49  ;;  %v494_v0 = vadd.f32 %v1786_v39, %v471_v53  ;;  %v512_v17 = vmax.f32 %v496_v5, 0.0 }
 0x203   :  { %v447_v61 = vpop.f32.mrf.mxu1 }
 0x204   :  { %v497_v3 = vadd.f32 %v1786_v39, %v474_v58  ;;  %v472_v4 = vmul.f32 %v447_v61, %v1669_v23  ;;  %1323 = vmatprep.mubr.bf16.mxu0 %v518_v60  ;;  %v510_v15 = vmax.f32 %v494_v0, 0.0 }
 0x205   :  { %1324 = vmatmul.mubr.bf16.gmra.mxu0 %v519_v62 }
 0x206   :  { %v495_v6 = vadd.f32 %v1786_v39, %v472_v4  ;;  %v513_v14 = vmax.f32 %v497_v3, 0.0  ;;  %v839_v39 = vld [vmem:[%s2041_s7 + $0x60] sm:$0xff] }
 0x207   :  { %v849_v29 = vpack.c.bf16 %v840_v27, %v839_v39 }
 0x208   :  { %v511_v16 = vmax.f32 %v495_v6, 0.0  ;;  %v521_v21 = vpack.c.bf16 %v513_v14, %v512_v17 }
 0x209   :  { %1365 = vmatprep.subr.bf16.mxu0 %v849_v29 }
 0x20a   :  { %v520_v19 = vpack.c.bf16 %v511_v16, %v510_v15  ;;  %1366 = vmatpush3.bf16.msra.mxu0 %v849_v29 }
 0x20b   :  { %1367 = vmatprep.subr.bf16.mxu0 %v848_v34 }
 0x20c   :  { %1327 = vmatprep.mubr.bf16.mxu0 %v520_v19 }
 0x20d   :  { %1328 = vmatmul.mubr.bf16.gmra.mxu0 %v521_v21 }
 0x20e   :  { %1368 = vmatpush3.bf16.msra.mxu0 %v848_v34 }
 0x20f   :  { %1369 = vmatprep.subr.bf16.mxu0 %v847_v38 }
 0x212   :  { %1370 = vmatpush3.bf16.msra.mxu0 %v847_v38 }
 0x2b5   :  { %v1317_v40 = vpop.f32.mrf.mxu0 }
 0x2b6   :  { %v645_v32 = vmul.f32 %v1317_v40, %v1702_v59  ;;  %v833_v40 = vld [vmem:[%s2041_s7 + $0x30] sm:$0xff] }
 0x2b7   :  { %v580_v41 = vpop.f32.mrf.mxu0 }
 0x2b8   :  { %v643_v37 = vmul.f32 %v580_v41, %v1709_v2  ;;  %v834_v41 = vld [vmem:[%s2041_s7 + $0x38] sm:$0xff] }
 0x2b9   :  { %v1318_v42 = vpop.f32.mrf.mxu0 }
 0x2ba   :  { %v646_v29 = vmul.f32 %v1318_v42, %v1699_v56  ;;  %v846_v42 = vpack.c.bf16 %v834_v41, %v833_v40 }
 0x2bb   :  { %v583_v44 = vpop.f32.mrf.mxu0 }
 0x2bc   :  { %v660_v34 = vpack.c.bf16 %v646_v29, %v645_v32  ;;  %v644_v36 = vmul.f32 %v583_v44, %v1706_v63  ;;  %1371 = vmatprep.subr.bf16.mxu0 %v846_v42  ;;  %v831_v44 = vld [vmem:[%s2041_s7 + $0x20] sm:$0xff] }
 0x2bd   :  { %v1321_v45 = vpop.f32.mrf.mxu0  ;;  %1372 = vmatpush3.bf16.msra.mxu0 %v846_v42 }
 0x2be   :  { %v649_v24 = vmul.f32 %v1321_v45, %v1688_v46  ;;  %v659_v38 = vpack.c.bf16 %v644_v36, %v643_v37  ;;  %v832_v45 = vld [vmem:[%s2041_s7 + $0x28] sm:$0xff] }
 0x2bf   :  { %v596_v47 = vpop.f32.mrf.mxu0 }
 0x2c0   :  { %v647_v27 = vmul.f32 %v596_v47, %v1695_v52  ;;  %v829_v47 = vld [vmem:[%s2041_s7 + $0x10] sm:$0xff] }
 0x2c1   :  { %v1322_v48 = vpop.f32.mrf.mxu0 }
 0x2c2   :  { %v650_v21 = vmul.f32 %v1322_v48, %v1685_v43  ;;  %v830_v48 = vld [vmem:[%s2041_s7 + $0x18] sm:$0xff] }
 0x2c3   :  { %v599_v49 = vpop.f32.mrf.mxu0 }
 0x2c4   :  { %v662_v39 = vpack.c.bf16 %v650_v21, %v649_v24  ;;  %v648_v26 = vmul.f32 %v599_v49, %v1692_v50  ;;  %v844_v49 = vpack.c.bf16 %v830_v48, %v829_v47 }
 0x2c5   :  { %v1325_v51 = vpop.f32.mrf.mxu0 }
 0x2c6   :  { %v653_v15 = vmul.f32 %v1325_v51, %v1675_v30  ;;  %v661_v31 = vpack.c.bf16 %v648_v26, %v647_v27  ;;  %v827_v51 = vld [vmem:[%s2041_s7] sm:$0xff] }
 0x2c7   :  { %v612_v53 = vpop.f32.mrf.mxu0 }
 0x2c8   :  { %v651_v19 = vmul.f32 %v612_v53, %v1679_v35  ;;  %v828_v53 = vld [vmem:[%s2041_s7 + $0x8] sm:$0xff] }
 0x2c9   :  { %v1326_v54 = vpop.f32.mrf.mxu0 }
 0x2ca   :  { %v654_v6 = vmul.f32 %v1326_v54, %v1673_v28  ;;  %v843_v54 = vpack.c.bf16 %v828_v53, %v827_v51 }
 0x2cb   :  { %v615_v55 = vpop.f32.mrf.mxu0 }
 0x2cc   :  { %v664_v16 = vpack.c.bf16 %v654_v6, %v653_v15  ;;  %v652_v17 = vmul.f32 %v615_v55, %v1677_v33 }
 0x2cd   :  { %v1329_v57 = vpop.f32.mrf.mxu0 }
 0x2ce   :  { %v657_v61 = vmul.f32 %v1329_v57, %v1667_v20  ;;  %v663_v22 = vpack.c.bf16 %v652_v17, %v651_v19 }
 0x2cf   :  { %v628_v58 = vpop.f32.mrf.mxu0 }
 0x2d0   :  { %v655_v3 = vmul.f32 %v628_v58, %v1665_v18 }
 0x2d1   :  { %v1330_v60 = vpop.f32.mrf.mxu0 }
 0x2d2   :  { %v658_v62 = vmul.f32 %v1330_v60, %v1671_v25 }
 0x2d3   :  { %v631_v0 = vpop.f32.mrf.mxu0 }
 0x2d4   :  { %v666_v4 = vpack.c.bf16 %v658_v62, %v657_v61  ;;  %v656_v5 = vmul.f32 %v631_v0, %v1669_v23  ;;  %v1895_v62 = vld [vmem:[%s2042_s6] ss:$0 sm:$0xff] }
 0x2d6   :  { %v665_v14 = vpack.c.bf16 %v656_v5, %v655_v3  ;;  %1331 = vmatprep.subr.bf16.mxu1 %v666_v4 }
 0x2d7   :  { %1332 = vmatpush3.bf16.msra.mxu1 %v666_v4 }
 0x2d8   :  { %1333 = vmatprep.subr.bf16.mxu1 %v665_v14 }
 0x2db   :  { %1334 = vmatpush3.bf16.msra.mxu1 %v665_v14 }
 0x2dc   :  { %1335 = vmatprep.subr.bf16.mxu1 %v664_v16 }
 0x2df   :  { %1336 = vmatpush3.bf16.msra.mxu1 %v664_v16 }
 0x2e0   :  { %1337 = vmatprep.subr.bf16.mxu1 %v663_v22 }
 0x2e3   :  { %1338 = vmatpush3.bf16.msra.mxu1 %v663_v22 }
 0x2e4   :  { %1339 = vmatprep.subr.bf16.mxu1 %v662_v39 }
 0x2e7   :  { %1340 = vmatpush3.bf16.msra.mxu1 %v662_v39 }
 0x2e8   :  { %1341 = vmatprep.subr.bf16.mxu1 %v661_v31 }
 0x2eb   :  { %1342 = vmatpush3.bf16.msra.mxu1 %v661_v31 }
 0x2ec   :  { %1343 = vmatprep.subr.bf16.mxu1 %v660_v34 }
 0x2ef   :  { %1344 = vmatpush3.bf16.msra.mxu1 %v660_v34 }
 0x2f0   :  { %1345 = vmatprep.subr.bf16.mxu1 %v659_v38 }
 0x2f3   :  { %1346 = vmatpush3.bf16.msra.mxu1 %v659_v38 }
 0x2f6   :  { %1348 = vmatmul.mubr.bf16.vlgmr.msra.gmra.mxu1 %v1717_v7 }
 0x2f7   :  { %1351 = vmatprep.mubr.bf16.mxu1 %v1722_v8 }
 0x2fe   :  { %1352 = vmatmul.mubr.bf16.gmra.mxu1 %v1729_v9 }
 0x2ff   :  { %1355 = vmatprep.mubr.bf16.mxu1 %v1734_v10 }
 0x306   :  { %1356 = vmatmul.mubr.bf16.gmra.mxu1 %v1741_v11 }
 0x307   :  { %1359 = vmatprep.mubr.bf16.mxu1 %v1746_v12 }
 0x30e   :  { %1360 = vmatmul.mubr.bf16.gmra.mxu1 %v1753_v13 }
 0x30f   :  { %1411 = vmatprep.mubr.bf16.mxu1 %v1636_v1  ;;  %v845_v1 = vpack.c.bf16 %v832_v45, %v831_v44 }
 0x311   :  { %1373 = vmatprep.subr.bf16.mxu0 %v845_v1 }
 0x312   :  { %1374 = vmatpush3.bf16.msra.mxu0 %v845_v1 }
 0x313   :  { %1375 = vmatprep.subr.bf16.mxu0 %v844_v49 }
 0x316   :  { %1376 = vmatpush3.bf16.msra.mxu0 %v844_v49 }
 0x317   :  { %1377 = vmatprep.subr.bf16.mxu0 %v843_v54 }
 0x31a   :  { %1378 = vmatpush3.bf16.msra.mxu0 %v843_v54 }
 0x3b6   :  { %v1349_v55 = vpop.f32.mrf.mxu1 }
 0x3b7   :  { %v766_v60 = vmul.f32 %v1349_v55, %v1702_v59 }
 0x3b8   :  { %v701_v57 = vpop.f32.mrf.mxu1 }
 0x3b9   :  { %v764_v58 = vmul.f32 %v701_v57, %v1709_v2  ;;  %v789_v14 = vadd.f32 %v1895_v62, %v766_v60 }
 0x3ba   :  { %v1350_v61 = vpop.f32.mrf.mxu1 }
 0x3bb   :  { %v767_v0 = vmul.f32 %v1350_v61, %v1699_v56  ;;  %v787_v4 = vadd.f32 %v1895_v62, %v764_v58  ;;  %v805_v39 = vmax.f32 %v789_v14, 0.0 }
 0x3bc   :  { %v704_v3 = vpop.f32.mrf.mxu1 }
 0x3bd   :  { %v790_v5 = vadd.f32 %v1895_v62, %v767_v0  ;;  %v765_v6 = vmul.f32 %v704_v3, %v1706_v63  ;;  %v803_v21 = vmax.f32 %v787_v4, 0.0 }
 0x3be   :  { %v1353_v15 = vpop.f32.mrf.mxu1 }
 0x3bf   :  { %v788_v16 = vadd.f32 %v1895_v62, %v765_v6  ;;  %v806_v17 = vmax.f32 %v790_v5, 0.0  ;;  %v770_v26 = vmul.f32 %v1353_v15, %v1688_v46 }
 0x3c0   :  { %v717_v19 = vpop.f32.mrf.mxu1 }
 0x3c1   :  { %v804_v22 = vmax.f32 %v788_v16, 0.0  ;;  %v768_v24 = vmul.f32 %v717_v19, %v1695_v52  ;;  %v820_v32 = vpack.c.bf16 %v806_v17, %v805_v39  ;;  %v793_v40 = vadd.f32 %v1895_v62, %v770_v26 }
 0x3c2   :  { %v1354_v27 = vpop.f32.mrf.mxu1 }
 0x3c3   :  { %v771_v29 = vmul.f32 %v1354_v27, %v1685_v43  ;;  %v819_v31 = vpack.c.bf16 %v804_v22, %v803_v21  ;;  %v791_v36 = vadd.f32 %v1895_v62, %v768_v24  ;;  %v809_v49 = vmax.f32 %v793_v40, 0.0 }
 0x3c4   :  { %v720_v34 = vpop.f32.mrf.mxu1 }
 0x3c5   :  { %v794_v37 = vadd.f32 %v1895_v62, %v771_v29  ;;  %v769_v38 = vmul.f32 %v720_v34, %v1692_v50  ;;  %1379 = vmatprep.mubr.bf16.mxu0 %v819_v31  ;;  %v807_v1 = vmax.f32 %v791_v36, 0.0 }
 0x3c6   :  { %v1357_v41 = vpop.f32.mrf.mxu1  ;;  %1380 = vmatmul.mubr.bf16.vlgmr.msra.gmra.mxu0 %v820_v32 }
 0x3c7   :  { %v792_v42 = vadd.f32 %v1895_v62, %v769_v38  ;;  %v810_v44 = vmax.f32 %v794_v37, 0.0  ;;  %v774_v51 = vmul.f32 %v1357_v41, %v1675_v30 }
 0x3c8   :  { %v733_v45 = vpop.f32.mrf.mxu1 }
 0x3c9   :  { %v808_v47 = vmax.f32 %v792_v42, 0.0  ;;  %v772_v48 = vmul.f32 %v733_v45, %v1679_v35  ;;  %v822_v58 = vpack.c.bf16 %v810_v44, %v809_v49  ;;  %v797_v3 = vadd.f32 %v1895_v62, %v774_v51 }
 0x3ca   :  { %v1358_v53 = vpop.f32.mrf.mxu1 }
 0x3cb   :  { %v775_v54 = vmul.f32 %v1358_v53, %v1673_v28  ;;  %v821_v55 = vpack.c.bf16 %v808_v47, %v807_v1  ;;  %v795_v60 = vadd.f32 %v1895_v62, %v772_v48  ;;  %v813_v19 = vmax.f32 %v797_v3, 0.0 }
 0x3cc   :  { %v736_v57 = vpop.f32.mrf.mxu1 }
 0x3cd   :  { %v798_v61 = vadd.f32 %v1895_v62, %v775_v54  ;;  %v773_v0 = vmul.f32 %v736_v57, %v1677_v33  ;;  %1383 = vmatprep.mubr.bf16.mxu0 %v821_v55  ;;  %v811_v15 = vmax.f32 %v795_v60, 0.0 }
 0x3ce   :  { %v1361_v4 = vpop.f32.mrf.mxu1  ;;  %1384 = vmatmul.mubr.bf16.gmra.mxu0 %v822_v58 }
 0x3cf   :  { %v796_v5 = vadd.f32 %v1895_v62, %v773_v0  ;;  %v814_v6 = vmax.f32 %v798_v61, 0.0  ;;  %v778_v21 = vmul.f32 %v1361_v4, %v1667_v20 }
 0x3d0   :  { %v749_v14 = vpop.f32.mrf.mxu1 }
 0x3d1   :  { %v812_v16 = vmax.f32 %v796_v5, 0.0  ;;  %v776_v17 = vmul.f32 %v749_v14, %v1665_v18  ;;  %v824_v27 = vpack.c.bf16 %v814_v6, %v813_v19  ;;  %v801_v34 = vadd.f32 %v1895_v62, %v778_v21 }
 0x3d2   :  { %v1362_v22 = vpop.f32.mrf.mxu1 }
 0x3d3   :  { %v779_v24 = vmul.f32 %v1362_v22, %v1671_v25  ;;  %v823_v39 = vpack.c.bf16 %v812_v16, %v811_v15  ;;  %v799_v29 = vadd.f32 %v1895_v62, %v776_v17  ;;  %v817_v41 = vmax.f32 %v801_v34, 0.0 }
 0x3d4   :  { %v752_v26 = vpop.f32.mrf.mxu1 }
 0x3d5   :  { %v802_v31 = vadd.f32 %v1895_v62, %v779_v24  ;;  %v777_v32 = vmul.f32 %v752_v26, %v1669_v23  ;;  %1387 = vmatprep.mubr.bf16.mxu0 %v823_v39  ;;  %v815_v38 = vmax.f32 %v799_v29, 0.0 }
 0x3d6   :  { %1388 = vmatmul.mubr.bf16.gmra.mxu0 %v824_v27 }
 0x3d7   :  { %v800_v36 = vadd.f32 %v1895_v62, %v777_v32  ;;  %v818_v37 = vmax.f32 %v802_v31, 0.0 }
 0x3d9   :  { %v816_v40 = vmax.f32 %v800_v36, 0.0  ;;  %v826_v44 = vpack.c.bf16 %v818_v37, %v817_v41 }
 0x3db   :  { %v825_v42 = vpack.c.bf16 %v816_v40, %v815_v38 }
 0x3dd   :  { %1391 = vmatprep.mubr.bf16.mxu0 %v825_v42 }
 0x3de   :  { %1392 = vmatmul.mubr.bf16.gmra.mxu0 %v826_v44 }
 0x486   :  { %v1381_v45 = vpop.f32.mrf.mxu0 }
 0x487   :  { %v950_v37 = vmul.f32 %v1381_v45, %v1702_v59  ;;  %v1953_v45 = vld [vmem:[%s2043_s8] ss:$0 sm:$0xff] }
 0x488   :  { %v885_v1 = vpop.f32.mrf.mxu0 }
 0x489   :  { %v948_v41 = vmul.f32 %v885_v1, %v1709_v2 }
 0x48a   :  { %v1382_v47 = vpop.f32.mrf.mxu0 }
 0x48b   :  { %v951_v34 = vmul.f32 %v1382_v47, %v1699_v56 }
 0x48c   :  { %v888_v48 = vpop.f32.mrf.mxu0 }
 0x48d   :  { %v965_v38 = vpack.c.bf16 %v951_v34, %v950_v37  ;;  %v949_v40 = vmul.f32 %v888_v48, %v1706_v63 }
 0x48e   :  { %v1385_v49 = vpop.f32.mrf.mxu0 }
 0x48f   :  { %v954_v27 = vmul.f32 %v1385_v49, %v1688_v46  ;;  %v964_v42 = vpack.c.bf16 %v949_v40, %v948_v41 }
 0x490   :  { %v901_v51 = vpop.f32.mrf.mxu0 }
 0x491   :  { %v952_v32 = vmul.f32 %v901_v51, %v1695_v52 }
 0x492   :  { %v1386_v53 = vpop.f32.mrf.mxu0 }
 0x493   :  { %v955_v39 = vmul.f32 %v1386_v53, %v1685_v43 }
 0x494   :  { %v904_v54 = vpop.f32.mrf.mxu0 }
 0x495   :  { %v967_v29 = vpack.c.bf16 %v955_v39, %v954_v27  ;;  %v953_v31 = vmul.f32 %v904_v54, %v1692_v50 }
 0x496   :  { %v1389_v55 = vpop.f32.mrf.mxu0 }
 0x497   :  { %v958_v19 = vmul.f32 %v1389_v55, %v1675_v30  ;;  %v966_v36 = vpack.c.bf16 %v953_v31, %v952_v32 }
 0x498   :  { %v917_v57 = vpop.f32.mrf.mxu0 }
 0x499   :  { %v956_v24 = vmul.f32 %v917_v57, %v1679_v35 }
 0x49a   :  { %v1390_v58 = vpop.f32.mrf.mxu0 }
 0x49b   :  { %v959_v16 = vmul.f32 %v1390_v58, %v1673_v28 }
 0x49c   :  { %v920_v62 = vpop.f32.mrf.mxu0 }
 0x49d   :  { %v969_v21 = vpack.c.bf16 %v959_v16, %v958_v19  ;;  %v957_v22 = vmul.f32 %v920_v62, %v1677_v33 }
 0x49e   :  { %v1393_v60 = vpop.f32.mrf.mxu0 }
 0x49f   :  { %v962_v3 = vmul.f32 %v1393_v60, %v1667_v20  ;;  %v968_v26 = vpack.c.bf16 %v957_v22, %v956_v24 }
 0x4a0   :  { %v933_v61 = vpop.f32.mrf.mxu0 }
 0x4a1   :  { %v960_v6 = vmul.f32 %v933_v61, %v1665_v18 }
 0x4a2   :  { %v1394_v0 = vpop.f32.mrf.mxu0 }
 0x4a3   :  { %v963_v4 = vmul.f32 %v1394_v0, %v1671_v25 }
 0x4a4   :  { %v936_v5 = vpop.f32.mrf.mxu0 }
 0x4a5   :  { %v971_v14 = vpack.c.bf16 %v963_v4, %v962_v3  ;;  %v961_v15 = vmul.f32 %v936_v5, %v1669_v23 }
 0x4a7   :  { %v970_v17 = vpack.c.bf16 %v961_v15, %v960_v6  ;;  %1395 = vmatprep.subr.bf16.mxu1 %v971_v14 }
 0x4a8   :  { %1396 = vmatpush3.bf16.msra.mxu1 %v971_v14 }
 0x4a9   :  { %1397 = vmatprep.subr.bf16.mxu1 %v970_v17 }
 0x4ac   :  { %1398 = vmatpush3.bf16.msra.mxu1 %v970_v17 }
 0x4ad   :  { %1399 = vmatprep.subr.bf16.mxu1 %v969_v21 }
 0x4b0   :  { %1400 = vmatpush3.bf16.msra.mxu1 %v969_v21 }
 0x4b1   :  { %1401 = vmatprep.subr.bf16.mxu1 %v968_v26 }
 0x4b4   :  { %1402 = vmatpush3.bf16.msra.mxu1 %v968_v26 }
 0x4b5   :  { %1403 = vmatprep.subr.bf16.mxu1 %v967_v29 }
 0x4b8   :  { %1404 = vmatpush3.bf16.msra.mxu1 %v967_v29 }
 0x4b9   :  { %1405 = vmatprep.subr.bf16.mxu1 %v966_v36 }
 0x4bc   :  { %1406 = vmatpush3.bf16.msra.mxu1 %v966_v36 }
 0x4bd   :  { %1407 = vmatprep.subr.bf16.mxu1 %v965_v38 }
 0x4c0   :  { %1408 = vmatpush3.bf16.msra.mxu1 %v965_v38 }
 0x4c1   :  { %1409 = vmatprep.subr.bf16.mxu1 %v964_v42 }
 0x4c4   :  { %1410 = vmatpush3.bf16.msra.mxu1 %v964_v42 }
 0x4c7   :  { %1412 = vmatmul.mubr.bf16.vlgmr.msra.gmra.mxu1 %v1717_v7 }
 0x4c8   :  { %1415 = vmatprep.mubr.bf16.mxu1 %v1722_v8 }
 0x4cf   :  { %1416 = vmatmul.mubr.bf16.gmra.mxu1 %v1729_v9 }
 0x4d0   :  { %1419 = vmatprep.mubr.bf16.mxu1 %v1734_v10 }
 0x4d7   :  { %1420 = vmatmul.mubr.bf16.gmra.mxu1 %v1741_v11 }
 0x4d8   :  { %1423 = vmatprep.mubr.bf16.mxu1 %v1746_v12 }
 0x4df   :  { %1424 = vmatmul.mubr.bf16.gmra.mxu1 %v1753_v13 }
 0x587   :  { %v1413_v44 = vpop.f32.mrf.mxu1 }
 0x588   :  { %v1071_v7 = vmul.f32 %v1413_v44, %v1702_v59 }
 0x589   :  { %v1006_v1 = vpop.f32.mrf.mxu1 }
 0x58a   :  { %v1094_v8 = vadd.f32 %v1953_v45, %v1071_v7  ;;  %v1069_v9 = vmul.f32 %v1006_v1, %v1709_v2 }
 0x58b   :  { %v1414_v10 = vpop.f32.mrf.mxu1 }
 0x58c   :  { %1110 = vst [vmem:[%s2044_s9 + $0x10] sm:$0xff] %v1094_v8  ;;  %v1092_v11 = vadd.f32 %v1953_v45, %v1069_v9  ;;  %v1072_v12 = vmul.f32 %v1414_v10, %v1699_v56 }
 0x58d   :  { %v1009_v13 = vpop.f32.mrf.mxu1 }
 0x58e   :  { %1108 = vst [vmem:[%s2044_s9] sm:$0xff] %v1092_v11  ;;  %v1095_v59 = vadd.f32 %v1953_v45, %v1072_v12  ;;  %v1070_v47 = vmul.f32 %v1009_v13, %v1706_v63 }
 0x58f   :  { %v1417_v48 = vpop.f32.mrf.mxu1 }
 0x590   :  { %1111 = vst [vmem:[%s2044_s9 + $0x18] sm:$0xff] %v1095_v59  ;;  %v1093_v2 = vadd.f32 %v1953_v45, %v1070_v47  ;;  %v1075_v49 = vmul.f32 %v1417_v48, %v1688_v46 }
 0x591   :  { %v1022_v51 = vpop.f32.mrf.mxu1 }
 0x592   :  { %1109 = vst [vmem:[%s2044_s9 + $0x8] sm:$0xff] %v1093_v2  ;;  %v1098_v56 = vadd.f32 %v1953_v45, %v1075_v49  ;;  %v1073_v53 = vmul.f32 %v1022_v51, %v1695_v52 }
 0x593   :  { %v1418_v54 = vpop.f32.mrf.mxu1 }
 0x594   :  { %1114 = vst [vmem:[%s2044_s9 + $0x30] sm:$0xff] %v1098_v56  ;;  %v1096_v63 = vadd.f32 %v1953_v45, %v1073_v53  ;;  %v1076_v55 = vmul.f32 %v1418_v54, %v1685_v43 }
 0x595   :  { %v1025_v57 = vpop.f32.mrf.mxu1 }
 0x596   :  { %1112 = vst [vmem:[%s2044_s9 + $0x20] sm:$0xff] %v1096_v63  ;;  %v1099_v46 = vadd.f32 %v1953_v45, %v1076_v55  ;;  %v1074_v58 = vmul.f32 %v1025_v57, %v1692_v50 }
 0x597   :  { %v1421_v62 = vpop.f32.mrf.mxu1 }
 0x598   :  { %1115 = vst [vmem:[%s2044_s9 + $0x38] sm:$0xff] %v1099_v46  ;;  %v1097_v52 = vadd.f32 %v1953_v45, %v1074_v58  ;;  %v1079_v60 = vmul.f32 %v1421_v62, %v1675_v30 }
 0x599   :  { %v1038_v61 = vpop.f32.mrf.mxu1 }
 0x59a   :  { %1113 = vst [vmem:[%s2044_s9 + $0x28] sm:$0xff] %v1097_v52  ;;  %v1102_v43 = vadd.f32 %v1953_v45, %v1079_v60  ;;  %v1077_v0 = vmul.f32 %v1038_v61, %v1679_v35 }
 0x59b   :  { %v1422_v3 = vpop.f32.mrf.mxu1 }
 0x59c   :  { %1118 = vst [vmem:[%s2044_s9 + $0x50] sm:$0xff] %v1102_v43  ;;  %v1100_v50 = vadd.f32 %v1953_v45, %v1077_v0  ;;  %v1080_v4 = vmul.f32 %v1422_v3, %v1673_v28 }
 0x59d   :  { %v1041_v5 = vpop.f32.mrf.mxu1 }
 0x59e   :  { %1116 = vst [vmem:[%s2044_s9 + $0x40] sm:$0xff] %v1100_v50  ;;  %v1103_v30 = vadd.f32 %v1953_v45, %v1080_v4  ;;  %v1078_v6 = vmul.f32 %v1041_v5, %v1677_v33 }
 0x59f   :  { %v1425_v14 = vpop.f32.mrf.mxu1 }
 0x5a0   :  { %1119 = vst [vmem:[%s2044_s9 + $0x58] sm:$0xff] %v1103_v30  ;;  %v1101_v35 = vadd.f32 %v1953_v45, %v1078_v6  ;;  %v1083_v15 = vmul.f32 %v1425_v14, %v1667_v20 }
 0x5a1   :  { %v1054_v16 = vpop.f32.mrf.mxu1 }
 0x5a2   :  { %1117 = vst [vmem:[%s2044_s9 + $0x48] sm:$0xff] %v1101_v35  ;;  %v1106_v28 = vadd.f32 %v1953_v45, %v1083_v15  ;;  %v1081_v17 = vmul.f32 %v1054_v16, %v1665_v18 }
 0x5a3   :  { %v1426_v19 = vpop.f32.mrf.mxu1 }
 0x5a4   :  { %1122 = vst [vmem:[%s2044_s9 + $0x70] sm:$0xff] %v1106_v28  ;;  %v1104_v33 = vadd.f32 %v1953_v45, %v1081_v17  ;;  %v1084_v21 = vmul.f32 %v1426_v19, %v1671_v25 }
 0x5a5   :  { %v1057_v22 = vpop.f32.mrf.mxu1 }
 0x5a6   :  { %1120 = vst [vmem:[%s2044_s9 + $0x60] sm:$0xff] %v1104_v33  ;;  %v1107_v20 = vadd.f32 %v1953_v45, %v1084_v21  ;;  %v1082_v24 = vmul.f32 %v1057_v22, %v1669_v23 }
 0x5a8   :  { %1123 = vst [vmem:[%s2044_s9 + $0x78] sm:$0xff] %v1107_v20  ;;  %v1105_v18 = vadd.f32 %v1953_v45, %v1082_v24 }
 0x5aa   :  { %1121 = vst [vmem:[%s2044_s9 + $0x68] sm:$0xff] %v1105_v18 }

</bundles_post_ra>
